<compile_context>
chip_gen: v5e
topology: v5e:2x2
jax: 0.10.0
libtpu: 0.0.40
codegen_flags: <defaults>
</compile_context>

<pallas_src>
import functools
import math

import jax
import jax.numpy as jnp
from jax.experimental import pallas as pl
from jax.experimental.pallas import tpu as pltpu

ACTIVATION = "ReLU"                  # activation_function
L2_NORMALIZE = True                  # l2_normalize_goal_embeddings
WORD_DROPOUT_P = 0.1                 # TODO(synk): dropout is identity at inference; not applied in kernel.
LN_EPS = 1e-5
L2_EPS = 1e-12
LANE = 128


def _act(x):
    if ACTIVATION == "ReLU":
        return jnp.maximum(x, 0.0)
    if ACTIVATION == "Tanh":
        return jnp.tanh(x)
    raise ValueError(f"unsupported activation {ACTIVATION}")


def _round_up(n, m):
    return (n + m - 1) // m * m


def _nbytes(shape, dtype):
    return math.prod(shape) * jnp.dtype(dtype).itemsize


# --------------------------------------------------------------------------
# Kernel
# --------------------------------------------------------------------------
def _encoder_kernel(x_ref, w1_ref, b1_ref, w2_ref, b2_ref, w3_ref, b3_ref,
                    gamma_ref, beta_ref, o_ref, *, latent_true):
    # Matmuls run in the weight dtype (f32 or bf16) with f32 accumulation on the MXU.
    wdt = w1_ref.dtype
    x = x_ref[...].astype(wdt)

    h = jnp.dot(x, w1_ref[...], preferred_element_type=jnp.float32)
    h = _act(h + b1_ref[...].astype(jnp.float32))
    h = jnp.dot(h.astype(wdt), w2_ref[...], preferred_element_type=jnp.float32)
    h = _act(h + b2_ref[...].astype(jnp.float32))
    y = jnp.dot(h.astype(wdt), w3_ref[...], preferred_element_type=jnp.float32)
    y = y + b3_ref[...].astype(jnp.float32)

    # Padded latent columns of y are exactly 0 (zero weight cols + zero bias),
    # so sums over the padded width equal sums over the true latent width.
    s1 = jnp.sum(y, axis=-1, keepdims=True)        # sum(y)        (XLU)
    s2 = jnp.sum(y * y, axis=-1, keepdims=True)    # sum(y^2)      (XLU)

    if L2_NORMALIZE:
        # F.normalize: y / max(||y||, eps) == y * rsqrt(max(sum(y^2), eps^2))  (EUP)
        inv = jax.lax.rsqrt(jnp.maximum(s2, L2_EPS * L2_EPS))
        y = y * inv
        s1 = s1 * inv
        s2 = s2 * (inv * inv)

    # LayerNorm over the TRUE latent width; var = E[y^2] - mean^2 (safe: after
    # L2 normalize |y| <= 1 in f32).
    inv_n = 1.0 / float(latent_true)
    mean = s1 * inv_n
    var = jnp.maximum(s2 * inv_n - mean * mean, 0.0)
    inv_std = jax.lax.rsqrt(var + LN_EPS)          # EUP
    out = (y - mean) * inv_std * gamma_ref[...].astype(jnp.float32) \
        + beta_ref[...].astype(jnp.float32)
    o_ref[...] = out.astype(o_ref.dtype)


# --------------------------------------------------------------------------
# Wrapper
# --------------------------------------------------------------------------
def prepare_params(params):
    """Pad / lay out parameters ONCE (outside the per-call path).

    hidden / latent dims are padded to multiples of 128 (lane-dense, MXU
    aligned); the input-feature dim is left unpadded so x never needs a
    wrapper-side pad.
    """
    w1, b1, w2, b2, w3, b3, gamma, beta = params
    in_f, hidden = w1.shape
    latent = w3.shape[1]
    hid_p = _round_up(hidden, LANE)
    lat_p = _round_up(latent, LANE)

    def pad_cols(a, cols):
        return jnp.pad(a, ((0, 0), (0, cols - a.shape[1])))

    def pad_both(a, rows, cols):
        return jnp.pad(a, ((0, rows - a.shape[0]), (0, cols - a.shape[1])))

    return {
        "w1": pad_cols(w1, hid_p),                 # (in_f,  hid_p)
        "b1": pad_cols(b1, hid_p),                 # (1,     hid_p)
        "w2": pad_both(w2, hid_p, hid_p),          # (hid_p, hid_p)
        "b2": pad_cols(b2, hid_p),                 # (1,     hid_p)
        "w3": pad_both(w3, hid_p, lat_p),          # (hid_p, lat_p)
        "b3": pad_cols(b3, lat_p),                 # (1,     lat_p)
        "gamma": pad_cols(gamma, lat_p),           # (1,     lat_p)
        "beta": pad_cols(beta, lat_p),             # (1,     lat_p)
        "in_features": in_f,
        "hidden": hidden,
        "latent": latent,
    }


def _vmem_cap_bytes():
    """Generation-aware VMEM cap with ~15% headroom for Mosaic scratch."""
    phys = 64 << 20  # conservative default: v7x per-TC physical VMEM
    try:
        phys = int(pltpu.get_tpu_info().vmem_capacity_bytes)
    except Exception:
        pass
    return int(phys * 0.85)


def _make_call(tb, n_tiles, B, in_f, hid_p, lat_p, latent, vmem_limit, cost,
               buffered_params):
    const = lambda i: (0, 0)
    if buffered_params:
        # Grid-invariant operands: single buffer (halves resident param VMEM).
        def pspec(shape):
            return pl.BlockSpec(shape, const, pipeline_mode=pl.Buffered(1))
    else:
        def pspec(shape):
            return pl.BlockSpec(shape, const)

    in_specs = [
        pl.BlockSpec((tb, in_f), lambda i: (i, 0)),   # x tile: pipelined over batch
        pspec((in_f, hid_p)),                         # weights / params: VMEM-resident
        pspec((1, hid_p)),
        pspec((hid_p, hid_p)),
        pspec((1, hid_p)),
        pspec((hid_p, lat_p)),
        pspec((1, lat_p)),
        pspec((1, lat_p)),
        pspec((1, lat_p)),
    ]
    out_specs = pl.BlockSpec((tb, lat_p), lambda i: (i, 0))

    return pl.pallas_call(
        functools.partial(_encoder_kernel, latent_true=latent),
        out_shape=jax.ShapeDtypeStruct((B, lat_p), jnp.float32),
        grid=(n_tiles,),
        in_specs=in_specs,
        out_specs=out_specs,
        compiler_params=pltpu.CompilerParams(
            dimension_semantics=("parallel",),   # shard batch tiles across TCs
            vmem_limit_bytes=vmem_limit,
        ),
        cost_estimate=cost,
    )


def language_goal_encoder(x, prep, *, batch_tile=None):
    """x: [B, in_features]. prep: output of prepare_params. Returns [B, latent] f32."""
    B, in_f = x.shape
    assert in_f == prep["in_features"], (in_f, prep["in_features"])
    hidden = prep["hidden"]
    latent = prep["latent"]
    hid_p = prep["w2"].shape[0]
    lat_p = prep["w3"].shape[1]

    # Sublane-aligned batch tile (8 rows f32, 16 bf16, 32 int8/fp8).
    itemsize = jnp.dtype(x.dtype).itemsize
    min_tile = max(8, 8 * (4 // max(itemsize, 1)))
    if batch_tile is None:
        # >= 2 grid steps whenever B allows it (feeds both v7x TensorCores),
        # capped at 512 to amortize per-step overhead with modest VMEM use.
        batch_tile = max(min_tile, min(512, _round_up(-(-B // 2), min_tile)))
    tb = batch_tile
    n_tiles = pl.cdiv(B, tb)

    # VMEM budget: double-buffered x/out tiles + resident params + activations.
    tile_bytes = _nbytes((tb, in_f), x.dtype) + _nbytes((tb, lat_p), jnp.float32)
    param_keys = ("w1", "b1", "w2", "b2", "w3", "b3", "gamma", "beta")
    param_bytes = sum(_nbytes(prep[k].shape, prep[k].dtype) for k in param_keys)
    act_bytes = 2 * _nbytes((tb, hid_p), jnp.float32) + _nbytes((tb, lat_p), jnp.float32)
    vmem_est = 2 * tile_bytes + 2 * param_bytes + act_bytes + (2 << 20)
    vmem_limit = int(min(max(vmem_est, 32 << 20), _vmem_cap_bytes()))

    # Advisory cost estimate so XLA schedules the custom call sensibly.
    flops = 2 * B * (in_f * hidden + hidden * hidden + hidden * latent)
    bytes_accessed = int(_nbytes((B, in_f), x.dtype)
                         + _nbytes((B, lat_p), jnp.float32)
                         + param_bytes)
    cost = pl.CostEstimate(flops=flops, transcendentals=2 * B,
                           bytes_accessed=bytes_accessed)

    args = (x, prep["w1"], prep["b1"], prep["w2"], prep["b2"],
            prep["w3"], prep["b3"], prep["gamma"], prep["beta"])

    try:
        out_p = _make_call(tb, n_tiles, B, in_f, hid_p, lat_p, latent,
                           vmem_limit, cost, buffered_params=True)(*args)
    except Exception:
        # pipeline_mode=pl.Buffered(1) unsupported on this jax/Mosaic version:
        # fall back to default (double-buffered) parameter specs.
        out_p = _make_call(tb, n_tiles, B, in_f, hid_p, lat_p, latent,
                           vmem_limit, cost, buffered_params=False)(*args)

    return out_p[:, :latent]


# --------------------------------------------------------------------------
# Params / reference
# --------------------------------------------------------------------------
def init_params(key, in_features, hidden_size, latent_goal_features, dtype=jnp.float32):
    ks = jax.random.split(key, 6)

    def linear(kw, kb, fan_in, fan_out):
        # PyTorch default init: U(-1/sqrt(fan_in), 1/sqrt(fan_in))
        bound = 1.0 / jnp.sqrt(fan_in)
        w = jax.random.uniform(kw, (fan_in, fan_out), jnp.float32, -bound, bound)
        b = jax.random.uniform(kb, (1, fan_out), jnp.float32, -bound, bound)
        return w.astype(dtype), b.astype(jnp.float32)

    w1, b1 = linear(ks[0], ks[1], in_features, hidden_size)
    w2, b2 = linear(ks[2], ks[3], hidden_size, hidden_size)
    w3, b3 = linear(ks[4], ks[5], hidden_size, latent_goal_features)
    gamma = jnp.ones((1, latent_goal_features), jnp.float32)
    beta = jnp.zeros((1, latent_goal_features), jnp.float32)
    return (w1, b1, w2, b2, w3, b3, gamma, beta)


def reference(x, params):
    w1, b1, w2, b2, w3, b3, gamma, beta = params
    w1, w2, w3 = (w.astype(jnp.float32) for w in (w1, w2, w3))
    h = _act(x @ w1 + b1)
    h = _act(h @ w2 + b2)
    y = h @ w3 + b3
    if L2_NORMALIZE:
        n = jnp.sqrt(jnp.sum(y * y, axis=1, keepdims=True))
        y = y / jnp.maximum(n, L2_EPS)
    mean = jnp.mean(y, axis=-1, keepdims=True)
    var = jnp.mean((y - mean) ** 2, axis=-1, keepdims=True)
    return (y - mean) / jnp.sqrt(var + LN_EPS) * gamma + beta


if __name__ == "__main__":
    B = 2
    in_features = 32
    hidden_size = 32
    latent_goal_features = 32

    key = jax.random.PRNGKey(0)
    kx, kp = jax.random.split(key)
    x = jax.random.normal(kx, (B, in_features), jnp.float32)
    params = init_params(kp, in_features, hidden_size, latent_goal_features)
    prep = prepare_params(params)   # padded once, outside the per-call path

    out = jax.block_until_ready(language_goal_encoder(x, prep))
    ref = reference(x, params)

    assert out.shape == (B, latent_goal_features)
    assert jnp.allclose(out, ref, atol=1e-4, rtol=1e-4), float(jnp.max(jnp.abs(out - ref)))
    print("KERNEL_OK")
</pallas_src>

<mosaic_0001>
module attributes {stable_mosaic.version = 11 : i64} {
  func.func @_encoder_kernel(%arg0: i32, %arg1: memref<8x32xf32, #tpu.memory_space<vmem>>, %arg2: memref<32x128xf32, #tpu.memory_space<vmem>>, %arg3: memref<1x128xf32, #tpu.memory_space<vmem>>, %arg4: memref<128x128xf32, #tpu.memory_space<vmem>>, %arg5: memref<1x128xf32, #tpu.memory_space<vmem>>, %arg6: memref<128x128xf32, #tpu.memory_space<vmem>>, %arg7: memref<1x128xf32, #tpu.memory_space<vmem>>, %arg8: memref<1x128xf32, #tpu.memory_space<vmem>>, %arg9: memref<1x128xf32, #tpu.memory_space<vmem>>, %arg10: memref<8x128xf32, #tpu.memory_space<vmem>>) attributes {dimension_semantics = [#tpu.dimension_semantics<parallel>], iteration_bounds = array<i64: 1>, scalar_prefetch = 0 : i64, scratch_operands = 0 : i64, tpu.core_type = #tpu.core_type<tc>, window_params = [{transform_indices = @transform_0, window_bounds = array<i64: 8, 32>}, {pipeline_mode = #tpu.pipeline_mode<synchronous>, transform_indices = @transform_1, window_bounds = array<i64: 32, 128>}, {pipeline_mode = #tpu.pipeline_mode<synchronous>, transform_indices = @transform_2, window_bounds = array<i64: 1, 128>}, {pipeline_mode = #tpu.pipeline_mode<synchronous>, transform_indices = @transform_3, window_bounds = array<i64: 128, 128>}, {pipeline_mode = #tpu.pipeline_mode<synchronous>, transform_indices = @transform_4, window_bounds = array<i64: 1, 128>}, {pipeline_mode = #tpu.pipeline_mode<synchronous>, transform_indices = @transform_5, window_bounds = array<i64: 128, 128>}, {pipeline_mode = #tpu.pipeline_mode<synchronous>, transform_indices = @transform_6, window_bounds = array<i64: 1, 128>}, {pipeline_mode = #tpu.pipeline_mode<synchronous>, transform_indices = @transform_7, window_bounds = array<i64: 1, 128>}, {pipeline_mode = #tpu.pipeline_mode<synchronous>, transform_indices = @transform_8, window_bounds = array<i64: 1, 128>}, {transform_indices = @transform_9, window_bounds = array<i64: 8, 128>}]} {
    %c0 = arith.constant 0 : index
    %c0_0 = arith.constant 0 : index
    %0 = vector.load %arg1[%c0, %c0_0] : memref<8x32xf32, #tpu.memory_space<vmem>>, vector<8x32xf32>
    %c0_1 = arith.constant 0 : index
    %c0_2 = arith.constant 0 : index
    %1 = vector.load %arg2[%c0_1, %c0_2] : memref<32x128xf32, #tpu.memory_space<vmem>>, vector<32x128xf32>
    %cst = arith.constant dense<0.000000e+00> : vector<8x128xf32>
    %2 = tpu.matmul %0, %1, %cst {dimension_numbers = #tpu.dot_dimension_numbers<[1], [0], [0], [1], [0, 0, 1, 1], [], []>} : vector<8x32xf32>, vector<32x128xf32>, vector<8x128xf32> -> vector<8x128xf32>
    %c0_3 = arith.constant 0 : index
    %c0_4 = arith.constant 0 : index
    %3 = vector.load %arg3[%c0_3, %c0_4] : memref<1x128xf32, #tpu.memory_space<vmem>>, vector<1x128xf32>
    %4 = vector.broadcast %3 : vector<1x128xf32> to vector<8x128xf32>
    %5 = arith.addf %2, %4 : vector<8x128xf32>
    %cst_5 = arith.constant 0.000000e+00 : f32
    %6 = vector.broadcast %cst_5 : f32 to vector<8x128xf32>
    %7 = arith.maximumf %5, %6 : vector<8x128xf32>
    %c0_6 = arith.constant 0 : index
    %c0_7 = arith.constant 0 : index
    %8 = vector.load %arg4[%c0_6, %c0_7] : memref<128x128xf32, #tpu.memory_space<vmem>>, vector<128x128xf32>
    %cst_8 = arith.constant dense<0.000000e+00> : vector<8x128xf32>
    %9 = tpu.matmul %7, %8, %cst_8 {dimension_numbers = #tpu.dot_dimension_numbers<[1], [0], [0], [1], [0, 0, 1, 1], [], []>} : vector<8x128xf32>, vector<128x128xf32>, vector<8x128xf32> -> vector<8x128xf32>
    %c0_9 = arith.constant 0 : index
    %c0_10 = arith.constant 0 : index
    %10 = vector.load %arg5[%c0_9, %c0_10] : memref<1x128xf32, #tpu.memory_space<vmem>>, vector<1x128xf32>
    %11 = vector.broadcast %10 : vector<1x128xf32> to vector<8x128xf32>
    %12 = arith.addf %9, %11 : vector<8x128xf32>
    %cst_11 = arith.constant 0.000000e+00 : f32
    %13 = vector.broadcast %cst_11 : f32 to vector<8x128xf32>
    %14 = arith.maximumf %12, %13 : vector<8x128xf32>
    %c0_12 = arith.constant 0 : index
    %c0_13 = arith.constant 0 : index
    %15 = vector.load %arg6[%c0_12, %c0_13] : memref<128x128xf32, #tpu.memory_space<vmem>>, vector<128x128xf32>
    %cst_14 = arith.constant dense<0.000000e+00> : vector<8x128xf32>
    %16 = tpu.matmul %14, %15, %cst_14 {dimension_numbers = #tpu.dot_dimension_numbers<[1], [0], [0], [1], [0, 0, 1, 1], [], []>} : vector<8x128xf32>, vector<128x128xf32>, vector<8x128xf32> -> vector<8x128xf32>
    %c0_15 = arith.constant 0 : index
    %c0_16 = arith.constant 0 : index
    %17 = vector.load %arg7[%c0_15, %c0_16] : memref<1x128xf32, #tpu.memory_space<vmem>>, vector<1x128xf32>
    %18 = vector.broadcast %17 : vector<1x128xf32> to vector<8x128xf32>
    %19 = arith.addf %16, %18 : vector<8x128xf32>
    %cst_17 = arith.constant dense<0.000000e+00> : vector<8xf32>
    %20 = vector.multi_reduction <add>, %19, %cst_17 [1] : vector<8x128xf32> to vector<8xf32>
    %21 = vector.shape_cast %20 : vector<8xf32> to vector<8x1xf32>
    %22 = arith.mulf %19, %19 : vector<8x128xf32>
    %cst_18 = arith.constant dense<0.000000e+00> : vector<8xf32>
    %23 = vector.multi_reduction <add>, %22, %cst_18 [1] : vector<8x128xf32> to vector<8xf32>
    %24 = vector.shape_cast %23 : vector<8xf32> to vector<8x1xf32>
    %cst_19 = arith.constant 1.000000e-24 : f32
    %25 = vector.broadcast %cst_19 : f32 to vector<8x1xf32>
    %26 = arith.maximumf %24, %25 : vector<8x1xf32>
    %27 = math.rsqrt %26 : vector<8x1xf32>
    %28 = vector.broadcast %27 : vector<8x1xf32> to vector<8x128xf32>
    %29 = arith.mulf %19, %28 : vector<8x128xf32>
    %30 = arith.mulf %21, %27 : vector<8x1xf32>
    %31 = arith.mulf %27, %27 : vector<8x1xf32>
    %32 = arith.mulf %24, %31 : vector<8x1xf32>
    %cst_20 = arith.constant 3.125000e-02 : f32
    %33 = vector.broadcast %cst_20 : f32 to vector<8x1xf32>
    %34 = arith.mulf %30, %33 : vector<8x1xf32>
    %cst_21 = arith.constant 3.125000e-02 : f32
    %35 = vector.broadcast %cst_21 : f32 to vector<8x1xf32>
    %36 = arith.mulf %32, %35 : vector<8x1xf32>
    %37 = arith.mulf %34, %34 : vector<8x1xf32>
    %38 = arith.subf %36, %37 : vector<8x1xf32>
    %cst_22 = arith.constant 0.000000e+00 : f32
    %39 = vector.broadcast %cst_22 : f32 to vector<8x1xf32>
    %40 = arith.maximumf %38, %39 : vector<8x1xf32>
    %cst_23 = arith.constant 9.99999974E-6 : f32
    %41 = vector.broadcast %cst_23 : f32 to vector<8x1xf32>
    %42 = arith.addf %40, %41 : vector<8x1xf32>
    %43 = math.rsqrt %42 : vector<8x1xf32>
    %44 = vector.broadcast %34 : vector<8x1xf32> to vector<8x128xf32>
    %45 = arith.subf %29, %44 : vector<8x128xf32>
    %46 = vector.broadcast %43 : vector<8x1xf32> to vector<8x128xf32>
    %47 = arith.mulf %45, %46 : vector<8x128xf32>
    %c0_24 = arith.constant 0 : index
    %c0_25 = arith.constant 0 : index
    %48 = vector.load %arg8[%c0_24, %c0_25] : memref<1x128xf32, #tpu.memory_space<vmem>>, vector<1x128xf32>
    %49 = vector.broadcast %48 : vector<1x128xf32> to vector<8x128xf32>
    %50 = arith.mulf %47, %49 : vector<8x128xf32>
    %c0_26 = arith.constant 0 : index
    %c0_27 = arith.constant 0 : index
    %51 = vector.load %arg9[%c0_26, %c0_27] : memref<1x128xf32, #tpu.memory_space<vmem>>, vector<1x128xf32>
    %52 = vector.broadcast %51 : vector<1x128xf32> to vector<8x128xf32>
    %53 = arith.addf %50, %52 : vector<8x128xf32>
    %c0_28 = arith.constant 0 : index
    %c0_29 = arith.constant 0 : index
    %54 = vector.load %arg10[%c0_28, %c0_29] : memref<8x128xf32, #tpu.memory_space<vmem>>, vector<8x128xf32>
    tpu.vector_store %arg10[%c0_28, %c0_29], %53 {strides = array<i32>} : memref<8x128xf32, #tpu.memory_space<vmem>>, vector<8x128xf32>,
    return
  }
  func.func @transform_0(%arg0: i32) -> (i32, i32) {
    %c0_i32 = arith.constant 0 : i32
    %c0_i32_0 = arith.constant 0 : i32
    return %arg0, %c0_i32 : i32, i32
  }
  func.func @transform_1(%arg0: i32) -> (i32, i32) {
    %c0_i32 = arith.constant 0 : i32
    %c0_i32_0 = arith.constant 0 : i32
    %c0_i32_1 = arith.constant 0 : i32
    return %c0_i32, %c0_i32_0 : i32, i32
  }
  func.func @transform_2(%arg0: i32) -> (i32, i32) {
    %c0_i32 = arith.constant 0 : i32
    %c0_i32_0 = arith.constant 0 : i32
    %c0_i32_1 = arith.constant 0 : i32
    return %c0_i32, %c0_i32_0 : i32, i32
  }
  func.func @transform_3(%arg0: i32) -> (i32, i32) {
    %c0_i32 = arith.constant 0 : i32
    %c0_i32_0 = arith.constant 0 : i32
    %c0_i32_1 = arith.constant 0 : i32
    return %c0_i32, %c0_i32_0 : i32, i32
  }
  func.func @transform_4(%arg0: i32) -> (i32, i32) {
    %c0_i32 = arith.constant 0 : i32
    %c0_i32_0 = arith.constant 0 : i32
    %c0_i32_1 = arith.constant 0 : i32
    return %c0_i32, %c0_i32_0 : i32, i32
  }
  func.func @transform_5(%arg0: i32) -> (i32, i32) {
    %c0_i32 = arith.constant 0 : i32
    %c0_i32_0 = arith.constant 0 : i32
    %c0_i32_1 = arith.constant 0 : i32
    return %c0_i32, %c0_i32_0 : i32, i32
  }
  func.func @transform_6(%arg0: i32) -> (i32, i32) {
    %c0_i32 = arith.constant 0 : i32
    %c0_i32_0 = arith.constant 0 : i32
    %c0_i32_1 = arith.constant 0 : i32
    return %c0_i32, %c0_i32_0 : i32, i32
  }
  func.func @transform_7(%arg0: i32) -> (i32, i32) {
    %c0_i32 = arith.constant 0 : i32
    %c0_i32_0 = arith.constant 0 : i32
    %c0_i32_1 = arith.constant 0 : i32
    return %c0_i32, %c0_i32_0 : i32, i32
  }
  func.func @transform_8(%arg0: i32) -> (i32, i32) {
    %c0_i32 = arith.constant 0 : i32
    %c0_i32_0 = arith.constant 0 : i32
    %c0_i32_1 = arith.constant 0 : i32
    return %c0_i32, %c0_i32_0 : i32, i32
  }
  func.func @transform_9(%arg0: i32) -> (i32, i32) {
    %c0_i32 = arith.constant 0 : i32
    %c0_i32_0 = arith.constant 0 : i32
    return %arg0, %c0_i32 : i32, i32
  }
}

module attributes {stable_mosaic.version = 11 : i64} {
  func.func @_encoder_kernel(%arg0: i32, %arg1: memref<8x32xf32, #tpu.memory_space<vmem>>, %arg2: memref<32x128xf32, #tpu.memory_space<vmem>>, %arg3: memref<1x128xf32, #tpu.memory_space<vmem>>, %arg4: memref<128x128xf32, #tpu.memory_space<vmem>>, %arg5: memref<1x128xf32, #tpu.memory_space<vmem>>, %arg6: memref<128x128xf32, #tpu.memory_space<vmem>>, %arg7: memref<1x128xf32, #tpu.memory_space<vmem>>, %arg8: memref<1x128xf32, #tpu.memory_space<vmem>>, %arg9: memref<1x128xf32, #tpu.memory_space<vmem>>, %arg10: memref<8x128xf32, #tpu.memory_space<vmem>>) attributes {dimension_semantics = [#tpu.dimension_semantics<parallel>], iteration_bounds = array<i64: 1>, scalar_prefetch = 0 : i64, scratch_operands = 0 : i64, tpu.core_type = #tpu.core_type<tc>, window_params = [{transform_indices = @transform_0, window_bounds = array<i64: 8, 32>}, {pipeline_mode = #tpu.pipeline_mode<synchronous>, transform_indices = @transform_1, window_bounds = array<i64: 32, 128>}, {pipeline_mode = #tpu.pipeline_mode<synchronous>, transform_indices = @transform_2, window_bounds = array<i64: 1, 128>}, {pipeline_mode = #tpu.pipeline_mode<synchronous>, transform_indices = @transform_3, window_bounds = array<i64: 128, 128>}, {pipeline_mode = #tpu.pipeline_mode<synchronous>, transform_indices = @transform_4, window_bounds = array<i64: 1, 128>}, {pipeline_mode = #tpu.pipeline_mode<synchronous>, transform_indices = @transform_5, window_bounds = array<i64: 128, 128>}, {pipeline_mode = #tpu.pipeline_mode<synchronous>, transform_indices = @transform_6, window_bounds = array<i64: 1, 128>}, {pipeline_mode = #tpu.pipeline_mode<synchronous>, transform_indices = @transform_7, window_bounds = array<i64: 1, 128>}, {pipeline_mode = #tpu.pipeline_mode<synchronous>, transform_indices = @transform_8, window_bounds = array<i64: 1, 128>}, {transform_indices = @transform_9, window_bounds = array<i64: 8, 128>}]} {
    %c0 = arith.constant 0 : index
    %c0_0 = arith.constant 0 : index
    %0 = vector.load %arg1[%c0, %c0_0] : memref<8x32xf32, #tpu.memory_space<vmem>>, vector<8x32xf32>
    %c0_1 = arith.constant 0 : index
    %c0_2 = arith.constant 0 : index
    %1 = vector.load %arg2[%c0_1, %c0_2] : memref<32x128xf32, #tpu.memory_space<vmem>>, vector<32x128xf32>
    %cst = arith.constant dense<0.000000e+00> : vector<8x128xf32>
    %2 = tpu.matmul %0, %1, %cst {dimension_numbers = #tpu.dot_dimension_numbers<[1], [0], [0], [1], [0, 0, 1, 1], [], []>} : vector<8x32xf32>, vector<32x128xf32>, vector<8x128xf32> -> vector<8x128xf32>
    %c0_3 = arith.constant 0 : index
    %c0_4 = arith.constant 0 : index
    %3 = vector.load %arg3[%c0_3, %c0_4] : memref<1x128xf32, #tpu.memory_space<vmem>>, vector<1x128xf32>
    %4 = vector.broadcast %3 : vector<1x128xf32> to vector<8x128xf32>
    %5 = arith.addf %2, %4 : vector<8x128xf32>
    %cst_5 = arith.constant 0.000000e+00 : f32
    %6 = vector.broadcast %cst_5 : f32 to vector<8x128xf32>
    %7 = arith.maximumf %5, %6 : vector<8x128xf32>
    %c0_6 = arith.constant 0 : index
    %c0_7 = arith.constant 0 : index
    %8 = vector.load %arg4[%c0_6, %c0_7] : memref<128x128xf32, #tpu.memory_space<vmem>>, vector<128x128xf32>
    %cst_8 = arith.constant dense<0.000000e+00> : vector<8x128xf32>
    %9 = tpu.matmul %7, %8, %cst_8 {dimension_numbers = #tpu.dot_dimension_numbers<[1], [0], [0], [1], [0, 0, 1, 1], [], []>} : vector<8x128xf32>, vector<128x128xf32>, vector<8x128xf32> -> vector<8x128xf32>
    %c0_9 = arith.constant 0 : index
    %c0_10 = arith.constant 0 : index
    %10 = vector.load %arg5[%c0_9, %c0_10] : memref<1x128xf32, #tpu.memory_space<vmem>>, vector<1x128xf32>
    %11 = vector.broadcast %10 : vector<1x128xf32> to vector<8x128xf32>
    %12 = arith.addf %9, %11 : vector<8x128xf32>
    %cst_11 = arith.constant 0.000000e+00 : f32
    %13 = vector.broadcast %cst_11 : f32 to vector<8x128xf32>
    %14 = arith.maximumf %12, %13 : vector<8x128xf32>
    %c0_12 = arith.constant 0 : index
    %c0_13 = arith.constant 0 : index
    %15 = vector.load %arg6[%c0_12, %c0_13] : memref<128x128xf32, #tpu.memory_space<vmem>>, vector<128x128xf32>
    %cst_14 = arith.constant dense<0.000000e+00> : vector<8x128xf32>
    %16 = tpu.matmul %14, %15, %cst_14 {dimension_numbers = #tpu.dot_dimension_numbers<[1], [0], [0], [1], [0, 0, 1, 1], [], []>} : vector<8x128xf32>, vector<128x128xf32>, vector<8x128xf32> -> vector<8x128xf32>
    %c0_15 = arith.constant 0 : index
    %c0_16 = arith.constant 0 : index
    %17 = vector.load %arg7[%c0_15, %c0_16] : memref<1x128xf32, #tpu.memory_space<vmem>>, vector<1x128xf32>
    %18 = vector.broadcast %17 : vector<1x128xf32> to vector<8x128xf32>
    %19 = arith.addf %16, %18 : vector<8x128xf32>
    %cst_17 = arith.constant dense<0.000000e+00> : vector<8xf32>
    %20 = vector.multi_reduction <add>, %19, %cst_17 [1] : vector<8x128xf32> to vector<8xf32>
    %21 = vector.shape_cast %20 : vector<8xf32> to vector<8x1xf32>
    %22 = arith.mulf %19, %19 : vector<8x128xf32>
    %cst_18 = arith.constant dense<0.000000e+00> : vector<8xf32>
    %23 = vector.multi_reduction <add>, %22, %cst_18 [1] : vector<8x128xf32> to vector<8xf32>
    %24 = vector.shape_cast %23 : vector<8xf32> to vector<8x1xf32>
    %cst_19 = arith.constant 1.000000e-24 : f32
    %25 = vector.broadcast %cst_19 : f32 to vector<8x1xf32>
    %26 = arith.maximumf %24, %25 : vector<8x1xf32>
    %27 = math.rsqrt %26 : vector<8x1xf32>
    %28 = vector.broadcast %27 : vector<8x1xf32> to vector<8x128xf32>
    %29 = arith.mulf %19, %28 : vector<8x128xf32>
    %30 = arith.mulf %21, %27 : vector<8x1xf32>
    %31 = arith.mulf %27, %27 : vector<8x1xf32>
    %32 = arith.mulf %24, %31 : vector<8x1xf32>
    %cst_20 = arith.constant 3.125000e-02 : f32
    %33 = vector.broadcast %cst_20 : f32 to vector<8x1xf32>
    %34 = arith.mulf %30, %33 : vector<8x1xf32>
    %cst_21 = arith.constant 3.125000e-02 : f32
    %35 = vector.broadcast %cst_21 : f32 to vector<8x1xf32>
    %36 = arith.mulf %32, %35 : vector<8x1xf32>
    %37 = arith.mulf %34, %34 : vector<8x1xf32>
    %38 = arith.subf %36, %37 : vector<8x1xf32>
    %cst_22 = arith.constant 0.000000e+00 : f32
    %39 = vector.broadcast %cst_22 : f32 to vector<8x1xf32>
    %40 = arith.maximumf %38, %39 : vector<8x1xf32>
    %cst_23 = arith.constant 9.99999974E-6 : f32
    %41 = vector.broadcast %cst_23 : f32 to vector<8x1xf32>
    %42 = arith.addf %40, %41 : vector<8x1xf32>
    %43 = math.rsqrt %42 : vector<8x1xf32>
    %44 = vector.broadcast %34 : vector<8x1xf32> to vector<8x128xf32>
    %45 = arith.subf %29, %44 : vector<8x128xf32>
    %46 = vector.broadcast %43 : vector<8x1xf32> to vector<8x128xf32>
    %47 = arith.mulf %45, %46 : vector<8x128xf32>
    %c0_24 = arith.constant 0 : index
    %c0_25 = arith.constant 0 : index
    %48 = vector.load %arg8[%c0_24, %c0_25] : memref<1x128xf32, #tpu.memory_space<vmem>>, vector<1x128xf32>
    %49 = vector.broadcast %48 : vector<1x128xf32> to vector<8x128xf32>
    %50 = arith.mulf %47, %49 : vector<8x128xf32>
    %c0_26 = arith.constant 0 : index
    %c0_27 = arith.constant 0 : index
    %51 = vector.load %arg9[%c0_26, %c0_27] : memref<1x128xf32, #tpu.memory_space<vmem>>, vector<1x128xf32>
    %52 = vector.broadcast %51 : vector<1x128xf32> to vector<8x128xf32>
    %53 = arith.addf %50, %52 : vector<8x128xf32>
    %c0_28 = arith.constant 0 : index
    %c0_29 = arith.constant 0 : index
    %54 = vector.load %arg10[%c0_28, %c0_29] : memref<8x128xf32, #tpu.memory_space<vmem>>, vector<8x128xf32>
    tpu.vector_store %arg10[%c0_28, %c0_29], %53 {strides = array<i32>} : memref<8x128xf32, #tpu.memory_space<vmem>>, vector<8x128xf32>,
    return
  }
  func.func @transform_0(%arg0: i32) -> (i32, i32) {
    %c0_i32 = arith.constant 0 : i32
    %c0_i32_0 = arith.constant 0 : i32
    return %arg0, %c0_i32 : i32, i32
  }
  func.func @transform_1(%arg0: i32) -> (i32, i32) {
    %c0_i32 = arith.constant 0 : i32
    %c0_i32_0 = arith.constant 0 : i32
    %c0_i32_1 = arith.constant 0 : i32
    return %c0_i32, %c0_i32_0 : i32, i32
  }
  func.func @transform_2(%arg0: i32) -> (i32, i32) {
    %c0_i32 = arith.constant 0 : i32
    %c0_i32_0 = arith.constant 0 : i32
    %c0_i32_1 = arith.constant 0 : i32
    return %c0_i32, %c0_i32_0 : i32, i32
  }
  func.func @transform_3(%arg0: i32) -> (i32, i32) {
    %c0_i32 = arith.constant 0 : i32
    %c0_i32_0 = arith.constant 0 : i32
    %c0_i32_1 = arith.constant 0 : i32
    return %c0_i32, %c0_i32_0 : i32, i32
  }
  func.func @transform_4(%arg0: i32) -> (i32, i32) {
    %c0_i32 = arith.constant 0 : i32
    %c0_i32_0 = arith.constant 0 : i32
    %c0_i32_1 = arith.constant 0 : i32
    return %c0_i32, %c0_i32_0 : i32, i32
  }
  func.func @transform_5(%arg0: i32) -> (i32, i32) {
    %c0_i32 = arith.constant 0 : i32
    %c0_i32_0 = arith.constant 0 : i32
    %c0_i32_1 = arith.constant 0 : i32
    return %c0_i32, %c0_i32_0 : i32, i32
  }
  func.func @transform_6(%arg0: i32) -> (i32, i32) {
    %c0_i32 = arith.constant 0 : i32
    %c0_i32_0 = arith.constant 0 : i32
    %c0_i32_1 = arith.constant 0 : i32
    return %c0_i32, %c0_i32_0 : i32, i32
  }
  func.func @transform_7(%arg0: i32) -> (i32, i32) {
    %c0_i32 = arith.constant 0 : i32
    %c0_i32_0 = arith.constant 0 : i32
    %c0_i32_1 = arith.constant 0 : i32
    return %c0_i32, %c0_i32_0 : i32, i32
  }
  func.func @transform_8(%arg0: i32) -> (i32, i32) {
    %c0_i32 = arith.constant 0 : i32
    %c0_i32_0 = arith.constant 0 : i32
    %c0_i32_1 = arith.constant 0 : i32
    return %c0_i32, %c0_i32_0 : i32, i32
  }
  func.func @transform_9(%arg0: i32) -> (i32, i32) {
    %c0_i32 = arith.constant 0 : i32
    %c0_i32_0 = arith.constant 0 : i32
    return %arg0, %c0_i32 : i32, i32
  }
}

</mosaic_0001>

<bundles_post_ra>
// kernel: tpu_custom_call.1
= control target key start
LH: loop header
LB: loop body
LE: loop exit
PB: predicated region body
PF: predicated region fallthrough
CT: control target
= control target key end

     0   :  { %14 = vsyncpa [#allocation3], 0  ;;  %s523_s0 = inlined_call_operand.hbm [shape: f32[2,32], index: 0, kind: input, shape index: {}]   ;;  %s524_s1 = inlined_call_operand.hbm [shape: f32[32,128], index: 1, kind: input, shape index: {}]   ;;  %s525_s2 = inlined_call_operand.vmem [shape: f32[1,128], index: 2, kind: input, shape index: {}]   ;;  %s526_s3 = inlined_call_operand.hbm [shape: f32[128,128], index: 3, kind: input, shape index: {}]   ;;  %s527_s4 = inlined_call_operand.vmem [shape: f32[1,128], index: 4, kind: input, shape index: {}]   ;;  %s528_s5 = inlined_call_operand.hbm [shape: f32[128,128], index: 5, kind: input, shape index: {}]   ;;  %s529_s6 = inlined_call_operand.vmem [shape: f32[1,128], index: 6, kind: input, shape index: {}]   ;;  %s530_s7 = inlined_call_operand.vmem [shape: f32[1,128], index: 7, kind: input, shape index: {}]   ;;  %s531_s8 = inlined_call_operand.vmem [shape: f32[1,128], index: 8, kind: input, shape index: {}]   ;;  %s532_s9 = inlined_call_operand.hbm [shape: f32[2,128], index: 9, kind: output, shape index: {}]  }
   0x1   :  { %15 = vsyncpa [#allocation6], 0 }
   0x2   :  { %16 = vsyncpa [#allocation9], 0 }
   0x3   :  { %17 = vsyncpa [#allocation4], 0  ;;  %s35_s11 = sshll.u32 %s524_s1, 4  ;;  %s36_s11 = int_to_ptr.hbm [resolvable:$true] %s35_s11 }
   0x4   :  { %21 = vsyncadd [#allocation3], 96  ;;  %s428_s12 = smov [#allocation5]   ;;  %s22_s16 = sshll.u32 %s523_s0, 4  ;;  %s23_s16 = int_to_ptr.hbm [resolvable:$true] %s22_s16 }
   0x5   :  { %s37_s13 = sshll.u32 %s428_s12, 4  ;;  %s429_s17 = smov 128   ;;  %s38_s13 = int_to_ptr.vmem [resolvable:$true] %s37_s13 }
   0x6   :  { %s430_s18 = smov 8   ;;  %s431_s19 = smov [#allocation2]  }
   0x7   :  { %43 = dma.hbm_to_vmem [thread:$0]  %s36_s11, 512, %s38_s13, [#allocation6], %s429_s17, %s429_s17, %s430_s18  }
   0x8   :  { %s24_s20 = sshll.u32 %s431_s19, 4  ;;  %s432_s21 = smov 32   ;;  %s25_s20 = int_to_ptr.vmem [resolvable:$true] %s24_s20 }
   0x9   :  { %s433_s22 = smov 2   ;;  %s50_s24 = sshll.u32 %s526_s3, 4  ;;  %s51_s24 = int_to_ptr.hbm [resolvable:$true] %s50_s24 }
   0xa   :  { %30 = dma.hbm_to_vmem [thread:$0]  %s23_s16, 32, %s25_s20, [#allocation3], %s432_s21, %s432_s21, %s433_s22  }
   0xb   :  { %s434_s25 = smov [#allocation7]   ;;  %s65_s28 = sshll.u32 %s528_s5, 4  ;;  %s66_s28 = int_to_ptr.hbm [resolvable:$true] %s65_s28 }
   0xc   :  { %s52_s0 = sshll.u32 %s434_s25, 4  ;;  %s435_s29 = smov [#allocation8]   ;;  %s53_s0 = int_to_ptr.vmem [resolvable:$true] %s52_s0 }
   0xd   :  { %58 = dma.hbm_to_vmem [thread:$0]  %s51_s24, 2048, %s53_s0, [#allocation6], %s429_s17, %s429_s17, %s430_s18  }
   0xe   :  { %s67_s30 = sshll.u32 %s435_s29, 4  ;;  %s68_s30 = int_to_ptr.vmem [resolvable:$true] %s67_s30 }
   0xf   :  { %73 = dma.hbm_to_vmem [thread:$0]  %s66_s28, 2048, %s68_s30, [#allocation9], %s429_s17, %s429_s17, %s430_s18  }
  0x10   :  { %420 = dma.done.wait [#allocation3], 128  }
  0x11   :  { %421 = vsyncadd [#allocation3], 4294967168 }
  0x12   :  { %422 = dma.done.wait [#allocation6], 2560  }
  0x13   :  { %423 = vsyncadd [#allocation6], 4294964736 }
  0x14   :  { %424 = dma.done.wait [#allocation9], 2048  }
  0x15   :  { %425 = vsyncadd [#allocation9], 4294965248  ;;  %v100_v0 = vld [vmem:[#allocation5 + $0x18] sm:$0xff]  ;;  %v99_v1 = vld [vmem:[#allocation5 + $0x10] sm:$0xff]  ;;  %vm105_vm0 = vcmask 261120  }
  0x16   :  { %121 = vmatpush.msra.mxu0 %v100_v0  ;;  %v145_v2 = vld [vmem:[#allocation7 + $0x78] sm:$0xff]  ;;  %v98_v3 = vld [vmem:[#allocation5 + $0x8] sm:$0xff]  ;;  %v144_v4 = vld [vmem:[#allocation7 + $0x70] sm:$0xff] }
  0x17   :  { %150 = vmatpush.msra.mxu1 %v145_v2  ;;  %v143_v5 = vld [vmem:[#allocation7 + $0x68] sm:$0xff]  ;;  %v97_v6 = vld [vmem:[#allocation5] sm:$0xff]  ;;  %v96_v7 = vld [vmem:[#allocation2] sm:$0xff] }
  0x18   :  { %122 = vmatpush.msra.mxu0 %v99_v1  ;;  %v142_v8 = vld [vmem:[#allocation7 + $0x60] sm:$0xff]  ;;  %v141_v9 = vld [vmem:[#allocation7 + $0x58] sm:$0xff]  ;;  %v140_v10 = vld [vmem:[#allocation7 + $0x50] sm:$0xff] }
  0x19   :  { %151 = vmatpush.msra.mxu1 %v144_v4  ;;  %v139_v11 = vld [vmem:[#allocation7 + $0x48] sm:$0xff]  ;;  %v138_v12 = vld [vmem:[#allocation7 + $0x40] sm:$0xff]  ;;  %v137_v13 = vld [vmem:[#allocation7 + $0x38] sm:$0xff] }
  0x1a   :  { %123 = vmatpush.msra.mxu0 %v98_v3  ;;  %v136_v14 = vld [vmem:[#allocation7 + $0x30] sm:$0xff]  ;;  %v135_v15 = vld [vmem:[#allocation7 + $0x28] sm:$0xff]  ;;  %v134_v16 = vld [vmem:[#allocation7 + $0x20] sm:$0xff] }
  0x1b   :  { %152 = vmatpush.msra.mxu1 %v143_v5  ;;  %v133_v17 = vld [vmem:[#allocation7 + $0x18] sm:$0xff]  ;;  %v132_v18 = vld [vmem:[#allocation7 + $0x10] sm:$0xff]  ;;  %v131_v19 = vld [vmem:[#allocation7 + $0x8] sm:$0xff] }
  0x1c   :  { %124 = vmatpush.msra.mxu0 %v97_v6  ;;  %v130_v20 = vld [vmem:[#allocation7] sm:$0xff]  ;;  %v186_v21 = vld [vmem:[#allocation8 + $0x78] sm:$0xff]  ;;  %v185_v22 = vld [vmem:[#allocation8 + $0x70] sm:$0xff] }
  0x1d   :  { %281 = vmatmul.msk.f32.vlgmr.msra.gmra.mxu0 %vm105_vm0, %v96_v7  ;;  %153 = vmatpush.msra.mxu1 %v142_v8  ;;  %v184_v23 = vld [vmem:[#allocation8 + $0x68] sm:$0xff]  ;;  %v183_v24 = vld [vmem:[#allocation8 + $0x60] sm:$0xff]  ;;  %v182_v25 = vld [vmem:[#allocation8 + $0x58] sm:$0xff] }
  0x1e   :  { %191 = vmatpush.msra.mxu2 %v186_v21  ;;  %v181_v26 = vld [vmem:[#allocation8 + $0x50] sm:$0xff]  ;;  %v180_v27 = vld [vmem:[#allocation8 + $0x48] sm:$0xff]  ;;  %v179_v28 = vld [vmem:[#allocation8 + $0x40] sm:$0xff] }
  0x1f   :  { %154 = vmatpush.msra.mxu1 %v141_v9  ;;  %v178_v29 = vld [vmem:[#allocation8 + $0x38] sm:$0xff]  ;;  %v177_v30 = vld [vmem:[#allocation8 + $0x30] sm:$0xff]  ;;  %v176_v31 = vld [vmem:[#allocation8 + $0x28] sm:$0xff] }
  0x20   :  { %192 = vmatpush.msra.mxu2 %v185_v22  ;;  %v175_v32 = vld [vmem:[#allocation8 + $0x20] sm:$0xff]  ;;  %v174_v33 = vld [vmem:[#allocation8 + $0x18] sm:$0xff]  ;;  %v173_v38 = vld [vmem:[#allocation8 + $0x10] sm:$0xff] }
  0x21   :  { %155 = vmatpush.msra.mxu1 %v140_v10  ;;  %v291_v34 = vld [vmem:[%s525_s2] ss:$0 sm:$0xff]  ;;  %v172_v39 = vld [vmem:[#allocation8 + $0x8] sm:$0xff]  ;;  %v171_v40 = vld [vmem:[#allocation8] sm:$0xff] }
  0x22   :  { %193 = vmatpush.msra.mxu2 %v184_v23  ;;  %v292_v41 = vld [vmem:[%s527_s4] ss:$0 sm:$0xff] }
  0x23   :  { %156 = vmatpush.msra.mxu1 %v139_v11  ;;  %v293_v45 = vld [vmem:[%s529_s6] ss:$0 sm:$0xff] }
  0x24   :  { %194 = vmatpush.msra.mxu2 %v183_v24  ;;  %v294_v11 = vld [vmem:[%s530_s7] ss:$0 sm:$0xff] }
  0x25   :  { %157 = vmatpush.msra.mxu1 %v138_v12 }
  0x26   :  { %195 = vmatpush.msra.mxu2 %v182_v25 }
  0x27   :  { %158 = vmatpush.msra.mxu1 %v137_v13 }
  0x28   :  { %196 = vmatpush.msra.mxu2 %v181_v26 }
  0x29   :  { %159 = vmatpush.msra.mxu1 %v136_v14  ;;  %v295_v14 = vld [vmem:[%s531_s8] ss:$0 sm:$0xff] }
  0x2a   :  { %197 = vmatpush.msra.mxu2 %v180_v27 }
  0x2b   :  { %160 = vmatpush.msra.mxu1 %v135_v15 }
  0x2c   :  { %198 = vmatpush.msra.mxu2 %v179_v28 }
  0x2d   :  { %161 = vmatpush.msra.mxu1 %v134_v16 }
  0x2e   :  { %199 = vmatpush.msra.mxu2 %v178_v29 }
  0x2f   :  { %162 = vmatpush.msra.mxu1 %v133_v17 }
  0x30   :  { %200 = vmatpush.msra.mxu2 %v177_v30 }
  0x31   :  { %163 = vmatpush.msra.mxu1 %v132_v18 }
  0x32   :  { %201 = vmatpush.msra.mxu2 %v176_v31 }
  0x33   :  { %164 = vmatpush.msra.mxu1 %v131_v19 }
  0x34   :  { %202 = vmatpush.msra.mxu2 %v175_v32 }
  0x35   :  { %165 = vmatpush.msra.mxu1 %v130_v20 }
  0x36   :  { %203 = vmatpush.msra.mxu2 %v174_v33 }
  0x38   :  { %204 = vmatpush.msra.mxu2 %v173_v38 }
  0x3a   :  { %205 = vmatpush.msra.mxu2 %v172_v39 }
  0x3c   :  { %206 = vmatpush.msra.mxu2 %v171_v40 }
  0x9a   :  { %v126_v35 = vpop.f32.mrf.mxu0 }
  0x9b   :  { %v127_v36 = vadd.f32 %v291_v34, %v126_v35 }
  0x9d   :  { %v129_v37 = vmax.f32 %v127_v36, 0.0 }
  0x9f   :  { %166 = vmatmul.f32.vlgmr.msra.gmra.mxu1 %v129_v37 }
 0x11c   :  { %v167_v42 = vpop.f32.mrf.mxu1 }
 0x11d   :  { %v168_v43 = vadd.f32 %v292_v41, %v167_v42 }
 0x11f   :  { %v170_v44 = vmax.f32 %v168_v43, 0.0 }
 0x121   :  { %207 = vmatmul.f32.vlgmr.msra.gmra.mxu2 %v170_v44 }
 0x1a4   :  { %v208_v46 = vpop.f32.mrf.mxu2 }
 0x1a5   :  { %v209_v47 = vadd.f32 %v293_v45, %v208_v46 }
 0x1a7   :  { %v213_v48 = vmul.f32 %v209_v47, %v209_v47 }
 0x1a9   :  { %214 = vadd.xlane.f32.xlu0 %v213_v48 }
 0x1b1   :  { %211 = vadd.xlane.f32.xlu0 %v209_v47 }
 0x21c   :  { %v215_v49 = vpop.xlane.xlu0 %214 }
 0x21d   :  { %v216_v50 = vmax.f32 %v215_v49, 1e-24 }
 0x21f   :  { %296 = vrsqrt.f32 %v216_v50  ;;  %vm223_vm2 = vweird.f32 %v216_v50 }
 0x224   :  { %v212_v58 = vpop.xlane.xlu0 %211 }
 0x225   :  { %v297_v51 = vpop.eup %296 }
 0x226   :  { %v218_v52 = vmul.f32 %v297_v51, %v216_v50  ;;  %vm224_vm1 = vweird.f32 %v297_v51 }
 0x227   :  { %vm225_vm3 = vmor %vm223_vm2, %vm224_vm1 }
 0x228   :  { %v219_v53 = vmul.f32 %v297_v51, %v218_v52 }
 0x22a   :  { %v220_v54 = vmul.f32 0.5, %v219_v53 }
 0x22c   :  { %v221_v55 = vsub.f32 1.5, %v220_v54 }
 0x22e   :  { %v222_v56 = vmul.f32 %v297_v51, %v221_v55 }
 0x230   :  { %v226_v57 = vsel %vm225_vm3, %v297_v51, %v222_v56 }
 0x231   :  { %v229_v59 = vmul.f32 %v226_v57, %v226_v57  ;;  %v228_v60 = vmul.f32 %v226_v57, %v212_v58  ;;  %v227_v9 = vmul.f32 %v226_v57, %v209_v47 }
 0x233   :  { %v230_v61 = vmul.f32 %v229_v59, %v215_v49  ;;  %v231_v62 = vmul.f32 0.03125, %v228_v60 }
 0x235   :  { %v232_v63 = vmul.f32 0.03125, %v230_v61  ;;  %v233_v0 = vmul.f32 %v231_v62, %v231_v62  ;;  %v247_v12 = vsub.f32 %v227_v9, %v231_v62 }
 0x237   :  { %v234_v1 = vsub.f32 %v232_v63, %v233_v0 }
 0x239   :  { %v235_v2 = vmax.f32 %v234_v1, 0.0 }
 0x23b   :  { %v236_v3 = vadd.f32 1e-05, %v235_v2 }
 0x23d   :  { %298 = vrsqrt.f32 %v236_v3  ;;  %vm243_vm5 = vweird.f32 %v236_v3 }
 0x243   :  { %v299_v4 = vpop.eup %298 }
 0x244   :  { %v238_v5 = vmul.f32 %v299_v4, %v236_v3  ;;  %vm244_vm4 = vweird.f32 %v299_v4 }
 0x245   :  { %vm245_vm6 = vmor %vm243_vm5, %vm244_vm4 }
 0x246   :  { %v239_v6 = vmul.f32 %v299_v4, %v238_v5 }
 0x248   :  { %v240_v7 = vmul.f32 0.5, %v239_v6 }
 0x24a   :  { %v241_v8 = vsub.f32 1.5, %v240_v7 }
 0x24c   :  { %v242_v10 = vmul.f32 %v299_v4, %v241_v8 }
 0x24e   :  { %v246_v13 = vsel %vm245_vm6, %v299_v4, %v242_v10 }
 0x24f   :  { %v248_v15 = vmul.f32 %v247_v12, %v246_v13 }
 0x251   :  { %v253_v16 = vmul.f32 %v294_v11, %v248_v15 }
 0x253   :  { %v258_v17 = vadd.f32 %v295_v14, %v253_v16 }
 0x255   :  { %259 = vst [vmem:[#allocation10] sm:$0xff] %v258_v17 }
 0x256   :  { %263 = vsyncadd [#allocation4], 96  ;;  %s266_s17 = sshll.u32 %s532_s9, 4  ;;  %s436_s18 = smov [#allocation10]   ;;  %s267_s17 = int_to_ptr.hbm [resolvable:$true] %s266_s17 }
 0x257   :  { %s264_s19 = sshll.u32 %s436_s18, 4  ;;  %s265_s19 = int_to_ptr.vmem [resolvable:$true] %s264_s19 }
 0x258   :  { %272 = dma.vmem_to_hbm [thread:$0]  %s265_s19, 32, %s267_s17, [#allocation4], %s432_s21, %s432_s21, %s433_s22  }
 0x259   :  { %426 = dma.done.wait [#allocation4], 128  }
 0x25a   :  { %427 = vsyncadd [#allocation4], 4294967168 }
 0x25b   :  { %277 = vsyncpa [#allocation3], 1 }
 0x25c   :  { %278 = vsyncpa [#allocation6], 1 }
 0x25d   :  { %279 = vsyncpa [#allocation9], 1 }
 0x25e   :  { %280 = vsyncpa [#allocation4], 1 }

// kernel: tpu_custom_call.1
= control target key start
LH: loop header
LB: loop body
LE: loop exit
PB: predicated region body
PF: predicated region fallthrough
CT: control target
= control target key end

     0   :  { %14 = vsyncpa [#allocation3], 0  ;;  %s523_s0 = inlined_call_operand.hbm [shape: f32[2,32], index: 0, kind: input, shape index: {}]   ;;  %s524_s1 = inlined_call_operand.hbm [shape: f32[32,128], index: 1, kind: input, shape index: {}]   ;;  %s525_s2 = inlined_call_operand.vmem [shape: f32[1,128], index: 2, kind: input, shape index: {}]   ;;  %s526_s3 = inlined_call_operand.hbm [shape: f32[128,128], index: 3, kind: input, shape index: {}]   ;;  %s527_s4 = inlined_call_operand.vmem [shape: f32[1,128], index: 4, kind: input, shape index: {}]   ;;  %s528_s5 = inlined_call_operand.hbm [shape: f32[128,128], index: 5, kind: input, shape index: {}]   ;;  %s529_s6 = inlined_call_operand.vmem [shape: f32[1,128], index: 6, kind: input, shape index: {}]   ;;  %s530_s7 = inlined_call_operand.vmem [shape: f32[1,128], index: 7, kind: input, shape index: {}]   ;;  %s531_s8 = inlined_call_operand.vmem [shape: f32[1,128], index: 8, kind: input, shape index: {}]   ;;  %s532_s9 = inlined_call_operand.hbm [shape: f32[2,128], index: 9, kind: output, shape index: {}]  }
   0x1   :  { %15 = vsyncpa [#allocation6], 0 }
   0x2   :  { %16 = vsyncpa [#allocation9], 0 }
   0x3   :  { %17 = vsyncpa [#allocation4], 0  ;;  %s35_s11 = sshll.u32 %s524_s1, 4  ;;  %s36_s11 = int_to_ptr.hbm [resolvable:$true] %s35_s11 }
   0x4   :  { %21 = vsyncadd [#allocation3], 96  ;;  %s428_s12 = smov [#allocation5]   ;;  %s22_s16 = sshll.u32 %s523_s0, 4  ;;  %s23_s16 = int_to_ptr.hbm [resolvable:$true] %s22_s16 }
   0x5   :  { %s37_s13 = sshll.u32 %s428_s12, 4  ;;  %s429_s17 = smov 128   ;;  %s38_s13 = int_to_ptr.vmem [resolvable:$true] %s37_s13 }
   0x6   :  { %s430_s18 = smov 8   ;;  %s431_s19 = smov [#allocation2]  }
   0x7   :  { %43 = dma.hbm_to_vmem [thread:$0]  %s36_s11, 512, %s38_s13, [#allocation6], %s429_s17, %s429_s17, %s430_s18  }
   0x8   :  { %s24_s20 = sshll.u32 %s431_s19, 4  ;;  %s432_s21 = smov 32   ;;  %s25_s20 = int_to_ptr.vmem [resolvable:$true] %s24_s20 }
   0x9   :  { %s433_s22 = smov 2   ;;  %s50_s24 = sshll.u32 %s526_s3, 4  ;;  %s51_s24 = int_to_ptr.hbm [resolvable:$true] %s50_s24 }
   0xa   :  { %30 = dma.hbm_to_vmem [thread:$0]  %s23_s16, 32, %s25_s20, [#allocation3], %s432_s21, %s432_s21, %s433_s22  }
   0xb   :  { %s434_s25 = smov [#allocation7]   ;;  %s65_s28 = sshll.u32 %s528_s5, 4  ;;  %s66_s28 = int_to_ptr.hbm [resolvable:$true] %s65_s28 }
   0xc   :  { %s52_s0 = sshll.u32 %s434_s25, 4  ;;  %s435_s29 = smov [#allocation8]   ;;  %s53_s0 = int_to_ptr.vmem [resolvable:$true] %s52_s0 }
   0xd   :  { %58 = dma.hbm_to_vmem [thread:$0]  %s51_s24, 2048, %s53_s0, [#allocation6], %s429_s17, %s429_s17, %s430_s18  }
   0xe   :  { %s67_s30 = sshll.u32 %s435_s29, 4  ;;  %s68_s30 = int_to_ptr.vmem [resolvable:$true] %s67_s30 }
   0xf   :  { %73 = dma.hbm_to_vmem [thread:$0]  %s66_s28, 2048, %s68_s30, [#allocation9], %s429_s17, %s429_s17, %s430_s18  }
  0x10   :  { %420 = dma.done.wait [#allocation3], 128  }
  0x11   :  { %421 = vsyncadd [#allocation3], 4294967168 }
  0x12   :  { %422 = dma.done.wait [#allocation6], 2560  }
  0x13   :  { %423 = vsyncadd [#allocation6], 4294964736 }
  0x14   :  { %424 = dma.done.wait [#allocation9], 2048  }
  0x15   :  { %425 = vsyncadd [#allocation9], 4294965248  ;;  %v100_v0 = vld [vmem:[#allocation5 + $0x18] sm:$0xff]  ;;  %v99_v1 = vld [vmem:[#allocation5 + $0x10] sm:$0xff]  ;;  %vm105_vm0 = vcmask 261120  }
  0x16   :  { %121 = vmatpush.msra.mxu0 %v100_v0  ;;  %v145_v2 = vld [vmem:[#allocation7 + $0x78] sm:$0xff]  ;;  %v98_v3 = vld [vmem:[#allocation5 + $0x8] sm:$0xff]  ;;  %v144_v4 = vld [vmem:[#allocation7 + $0x70] sm:$0xff] }
  0x17   :  { %150 = vmatpush.msra.mxu1 %v145_v2  ;;  %v143_v5 = vld [vmem:[#allocation7 + $0x68] sm:$0xff]  ;;  %v97_v6 = vld [vmem:[#allocation5] sm:$0xff]  ;;  %v96_v7 = vld [vmem:[#allocation2] sm:$0xff] }
  0x18   :  { %122 = vmatpush.msra.mxu0 %v99_v1  ;;  %v142_v8 = vld [vmem:[#allocation7 + $0x60] sm:$0xff]  ;;  %v141_v9 = vld [vmem:[#allocation7 + $0x58] sm:$0xff]  ;;  %v140_v10 = vld [vmem:[#allocation7 + $0x50] sm:$0xff] }
  0x19   :  { %151 = vmatpush.msra.mxu1 %v144_v4  ;;  %v139_v11 = vld [vmem:[#allocation7 + $0x48] sm:$0xff]  ;;  %v138_v12 = vld [vmem:[#allocation7 + $0x40] sm:$0xff]  ;;  %v137_v13 = vld [vmem:[#allocation7 + $0x38] sm:$0xff] }
  0x1a   :  { %123 = vmatpush.msra.mxu0 %v98_v3  ;;  %v136_v14 = vld [vmem:[#allocation7 + $0x30] sm:$0xff]  ;;  %v135_v15 = vld [vmem:[#allocation7 + $0x28] sm:$0xff]  ;;  %v134_v16 = vld [vmem:[#allocation7 + $0x20] sm:$0xff] }
  0x1b   :  { %152 = vmatpush.msra.mxu1 %v143_v5  ;;  %v133_v17 = vld [vmem:[#allocation7 + $0x18] sm:$0xff]  ;;  %v132_v18 = vld [vmem:[#allocation7 + $0x10] sm:$0xff]  ;;  %v131_v19 = vld [vmem:[#allocation7 + $0x8] sm:$0xff] }
  0x1c   :  { %124 = vmatpush.msra.mxu0 %v97_v6  ;;  %v130_v20 = vld [vmem:[#allocation7] sm:$0xff]  ;;  %v186_v21 = vld [vmem:[#allocation8 + $0x78] sm:$0xff]  ;;  %v185_v22 = vld [vmem:[#allocation8 + $0x70] sm:$0xff] }
  0x1d   :  { %281 = vmatmul.msk.f32.vlgmr.msra.gmra.mxu0 %vm105_vm0, %v96_v7  ;;  %153 = vmatpush.msra.mxu1 %v142_v8  ;;  %v184_v23 = vld [vmem:[#allocation8 + $0x68] sm:$0xff]  ;;  %v183_v24 = vld [vmem:[#allocation8 + $0x60] sm:$0xff]  ;;  %v182_v25 = vld [vmem:[#allocation8 + $0x58] sm:$0xff] }
  0x1e   :  { %191 = vmatpush.msra.mxu2 %v186_v21  ;;  %v181_v26 = vld [vmem:[#allocation8 + $0x50] sm:$0xff]  ;;  %v180_v27 = vld [vmem:[#allocation8 + $0x48] sm:$0xff]  ;;  %v179_v28 = vld [vmem:[#allocation8 + $0x40] sm:$0xff] }
  0x1f   :  { %154 = vmatpush.msra.mxu1 %v141_v9  ;;  %v178_v29 = vld [vmem:[#allocation8 + $0x38] sm:$0xff]  ;;  %v177_v30 = vld [vmem:[#allocation8 + $0x30] sm:$0xff]  ;;  %v176_v31 = vld [vmem:[#allocation8 + $0x28] sm:$0xff] }
  0x20   :  { %192 = vmatpush.msra.mxu2 %v185_v22  ;;  %v175_v32 = vld [vmem:[#allocation8 + $0x20] sm:$0xff]  ;;  %v174_v33 = vld [vmem:[#allocation8 + $0x18] sm:$0xff]  ;;  %v173_v38 = vld [vmem:[#allocation8 + $0x10] sm:$0xff] }
  0x21   :  { %155 = vmatpush.msra.mxu1 %v140_v10  ;;  %v291_v34 = vld [vmem:[%s525_s2] ss:$0 sm:$0xff]  ;;  %v172_v39 = vld [vmem:[#allocation8 + $0x8] sm:$0xff]  ;;  %v171_v40 = vld [vmem:[#allocation8] sm:$0xff] }
  0x22   :  { %193 = vmatpush.msra.mxu2 %v184_v23  ;;  %v292_v41 = vld [vmem:[%s527_s4] ss:$0 sm:$0xff] }
  0x23   :  { %156 = vmatpush.msra.mxu1 %v139_v11  ;;  %v293_v45 = vld [vmem:[%s529_s6] ss:$0 sm:$0xff] }
  0x24   :  { %194 = vmatpush.msra.mxu2 %v183_v24  ;;  %v294_v11 = vld [vmem:[%s530_s7] ss:$0 sm:$0xff] }
  0x25   :  { %157 = vmatpush.msra.mxu1 %v138_v12 }
  0x26   :  { %195 = vmatpush.msra.mxu2 %v182_v25 }
  0x27   :  { %158 = vmatpush.msra.mxu1 %v137_v13 }
  0x28   :  { %196 = vmatpush.msra.mxu2 %v181_v26 }
  0x29   :  { %159 = vmatpush.msra.mxu1 %v136_v14  ;;  %v295_v14 = vld [vmem:[%s531_s8] ss:$0 sm:$0xff] }
  0x2a   :  { %197 = vmatpush.msra.mxu2 %v180_v27 }
  0x2b   :  { %160 = vmatpush.msra.mxu1 %v135_v15 }
  0x2c   :  { %198 = vmatpush.msra.mxu2 %v179_v28 }
  0x2d   :  { %161 = vmatpush.msra.mxu1 %v134_v16 }
  0x2e   :  { %199 = vmatpush.msra.mxu2 %v178_v29 }
  0x2f   :  { %162 = vmatpush.msra.mxu1 %v133_v17 }
  0x30   :  { %200 = vmatpush.msra.mxu2 %v177_v30 }
  0x31   :  { %163 = vmatpush.msra.mxu1 %v132_v18 }
  0x32   :  { %201 = vmatpush.msra.mxu2 %v176_v31 }
  0x33   :  { %164 = vmatpush.msra.mxu1 %v131_v19 }
  0x34   :  { %202 = vmatpush.msra.mxu2 %v175_v32 }
  0x35   :  { %165 = vmatpush.msra.mxu1 %v130_v20 }
  0x36   :  { %203 = vmatpush.msra.mxu2 %v174_v33 }
  0x38   :  { %204 = vmatpush.msra.mxu2 %v173_v38 }
  0x3a   :  { %205 = vmatpush.msra.mxu2 %v172_v39 }
  0x3c   :  { %206 = vmatpush.msra.mxu2 %v171_v40 }
  0x9a   :  { %v126_v35 = vpop.f32.mrf.mxu0 }
  0x9b   :  { %v127_v36 = vadd.f32 %v291_v34, %v126_v35 }
  0x9d   :  { %v129_v37 = vmax.f32 %v127_v36, 0.0 }
  0x9f   :  { %166 = vmatmul.f32.vlgmr.msra.gmra.mxu1 %v129_v37 }
 0x11c   :  { %v167_v42 = vpop.f32.mrf.mxu1 }
 0x11d   :  { %v168_v43 = vadd.f32 %v292_v41, %v167_v42 }
 0x11f   :  { %v170_v44 = vmax.f32 %v168_v43, 0.0 }
 0x121   :  { %207 = vmatmul.f32.vlgmr.msra.gmra.mxu2 %v170_v44 }
 0x1a4   :  { %v208_v46 = vpop.f32.mrf.mxu2 }
 0x1a5   :  { %v209_v47 = vadd.f32 %v293_v45, %v208_v46 }
 0x1a7   :  { %v213_v48 = vmul.f32 %v209_v47, %v209_v47 }
 0x1a9   :  { %214 = vadd.xlane.f32.xlu0 %v213_v48 }
 0x1b1   :  { %211 = vadd.xlane.f32.xlu0 %v209_v47 }
 0x21c   :  { %v215_v49 = vpop.xlane.xlu0 %214 }
 0x21d   :  { %v216_v50 = vmax.f32 %v215_v49, 1e-24 }
 0x21f   :  { %296 = vrsqrt.f32 %v216_v50  ;;  %vm223_vm2 = vweird.f32 %v216_v50 }
 0x224   :  { %v212_v58 = vpop.xlane.xlu0 %211 }
 0x225   :  { %v297_v51 = vpop.eup %296 }
 0x226   :  { %v218_v52 = vmul.f32 %v297_v51, %v216_v50  ;;  %vm224_vm1 = vweird.f32 %v297_v51 }
 0x227   :  { %vm225_vm3 = vmor %vm223_vm2, %vm224_vm1 }
 0x228   :  { %v219_v53 = vmul.f32 %v297_v51, %v218_v52 }
 0x22a   :  { %v220_v54 = vmul.f32 0.5, %v219_v53 }
 0x22c   :  { %v221_v55 = vsub.f32 1.5, %v220_v54 }
 0x22e   :  { %v222_v56 = vmul.f32 %v297_v51, %v221_v55 }
 0x230   :  { %v226_v57 = vsel %vm225_vm3, %v297_v51, %v222_v56 }
 0x231   :  { %v229_v59 = vmul.f32 %v226_v57, %v226_v57  ;;  %v228_v60 = vmul.f32 %v226_v57, %v212_v58  ;;  %v227_v9 = vmul.f32 %v226_v57, %v209_v47 }
 0x233   :  { %v230_v61 = vmul.f32 %v229_v59, %v215_v49  ;;  %v231_v62 = vmul.f32 0.03125, %v228_v60 }
 0x235   :  { %v232_v63 = vmul.f32 0.03125, %v230_v61  ;;  %v233_v0 = vmul.f32 %v231_v62, %v231_v62  ;;  %v247_v12 = vsub.f32 %v227_v9, %v231_v62 }
 0x237   :  { %v234_v1 = vsub.f32 %v232_v63, %v233_v0 }
 0x239   :  { %v235_v2 = vmax.f32 %v234_v1, 0.0 }
 0x23b   :  { %v236_v3 = vadd.f32 1e-05, %v235_v2 }
 0x23d   :  { %298 = vrsqrt.f32 %v236_v3  ;;  %vm243_vm5 = vweird.f32 %v236_v3 }
 0x243   :  { %v299_v4 = vpop.eup %298 }
 0x244   :  { %v238_v5 = vmul.f32 %v299_v4, %v236_v3  ;;  %vm244_vm4 = vweird.f32 %v299_v4 }
 0x245   :  { %vm245_vm6 = vmor %vm243_vm5, %vm244_vm4 }
 0x246   :  { %v239_v6 = vmul.f32 %v299_v4, %v238_v5 }
 0x248   :  { %v240_v7 = vmul.f32 0.5, %v239_v6 }
 0x24a   :  { %v241_v8 = vsub.f32 1.5, %v240_v7 }
 0x24c   :  { %v242_v10 = vmul.f32 %v299_v4, %v241_v8 }
 0x24e   :  { %v246_v13 = vsel %vm245_vm6, %v299_v4, %v242_v10 }
 0x24f   :  { %v248_v15 = vmul.f32 %v247_v12, %v246_v13 }
 0x251   :  { %v253_v16 = vmul.f32 %v294_v11, %v248_v15 }
 0x253   :  { %v258_v17 = vadd.f32 %v295_v14, %v253_v16 }
 0x255   :  { %259 = vst [vmem:[#allocation10] sm:$0xff] %v258_v17 }
 0x256   :  { %263 = vsyncadd [#allocation4], 96  ;;  %s266_s17 = sshll.u32 %s532_s9, 4  ;;  %s436_s18 = smov [#allocation10]   ;;  %s267_s17 = int_to_ptr.hbm [resolvable:$true] %s266_s17 }
 0x257   :  { %s264_s19 = sshll.u32 %s436_s18, 4  ;;  %s265_s19 = int_to_ptr.vmem [resolvable:$true] %s264_s19 }
 0x258   :  { %272 = dma.vmem_to_hbm [thread:$0]  %s265_s19, 32, %s267_s17, [#allocation4], %s432_s21, %s432_s21, %s433_s22  }
 0x259   :  { %426 = dma.done.wait [#allocation4], 128  }
 0x25a   :  { %427 = vsyncadd [#allocation4], 4294967168 }
 0x25b   :  { %277 = vsyncpa [#allocation3], 1 }
 0x25c   :  { %278 = vsyncpa [#allocation6], 1 }
 0x25d   :  { %279 = vsyncpa [#allocation9], 1 }
 0x25e   :  { %280 = vsyncpa [#allocation4], 1 }

</bundles_post_ra>
